<compile_context>
chip_gen: v7x
topology: tpu7x:2x2x1
jax: 0.10.0
libtpu: 0.0.40
codegen_flags: <defaults>
</compile_context>

<pallas_src>
import functools

import jax
import jax.numpy as jnp
from jax.experimental import pallas as pl
from jax.experimental.pallas import tpu as pltpu

_MIB = 1024 * 1024


def _round_up(v, mult):
    return ((v + mult - 1) // mult) * mult


# --------------------------------------------------------------------------
# Kernel body
# --------------------------------------------------------------------------
def _mlpend_body(x_ref, w1_ref, b1_ref, g_ref, be_ref, w2a_ref, b2_ref,
                 o_ref, w2b_ref, *, eps):
    x = x_ref[...]                                            # (tm, Din) bf16

    # ---- layer1 (bf16 x bf16 -> f32 accum on MXU) + bias ----------------
    h = jnp.dot(x, w1_ref[...], preferred_element_type=jnp.float32)
    h = h + b1_ref[...]

    # ---- LayerNorm (one-pass stats in f32, var clamped) ------------------
    mu = jnp.mean(h, axis=-1, keepdims=True)
    m2 = jnp.mean(h * h, axis=-1, keepdims=True)
    var = jnp.maximum(m2 - mu * mu, 0.0)
    hn = (h - mu) * jax.lax.rsqrt(var + eps) * g_ref[...] + be_ref[...]

    a = jnp.maximum(hn, 0.0)                                  # ReLU; dropout1 = id

    # ---- layer2 : cat([a, x]) @ W2.T  ==  a @ w2a + x @ w2b --------------
    out = jnp.dot(a.astype(w2a_ref.dtype), w2a_ref[...],
                  preferred_element_type=jnp.float32)
    out = out + b2_ref[...]
    if w2b_ref is not None:                                   # residual branch
        out = out + jnp.dot(x, w2b_ref[...], preferred_element_type=jnp.float32)

    o_ref[...] = out.astype(o_ref.dtype)                      # dropout2 = id


def _kernel_residual(x_ref, w1_ref, b1_ref, g_ref, be_ref, w2a_ref, w2b_ref,
                     b2_ref, o_ref, *, eps):
    _mlpend_body(x_ref, w1_ref, b1_ref, g_ref, be_ref, w2a_ref, b2_ref,
                 o_ref, w2b_ref, eps=eps)


def _kernel_plain(x_ref, w1_ref, b1_ref, g_ref, be_ref, w2a_ref,
                  b2_ref, o_ref, *, eps):
    _mlpend_body(x_ref, w1_ref, b1_ref, g_ref, be_ref, w2a_ref, b2_ref,
                 o_ref, None, eps=eps)


# --------------------------------------------------------------------------
# Wrapper
# --------------------------------------------------------------------------
def mlpend_forward(x, params, *, residual, eps=1e-5,
                   compute_dtype=jnp.bfloat16):
    """params = (w1 (Din,H), b1 (1,H), gamma (1,H), beta (1,H),
                 w2a (H,Dout), w2b (Din,Dout) | None, b2 (1,Dout)).

    w2a / w2b are the two row-blocks of the PyTorch layer2 weight (transposed),
    so  cat([relu_ln, x]) @ W2.T  ==  relu_ln @ w2a + x @ w2b.
    """
    w1, b1, gamma, beta, w2a, w2b, b2 = params
    d_in = x.shape[-1]
    lead = x.shape[:-1]
    out_dtype = x.dtype
    d_hidden = w1.shape[1]
    d_out = w2a.shape[1]

    # Flatten leading dims; matmul operands in bf16, everything else f32.
    x2 = x.reshape(-1, d_in).astype(compute_dtype)
    m = x2.shape[0]
    w1c = w1.astype(compute_dtype)
    w2ac = w2a.astype(compute_dtype)
    w2bc = w2b.astype(compute_dtype) if residual else None
    b1f = b1.astype(jnp.float32)
    gf = gamma.astype(jnp.float32)
    bef = beta.astype(jnp.float32)
    b2f = b2.astype(jnp.float32)

    # ---- VMEM-aware row-tile selection -----------------------------------
    w_item = jnp.dtype(compute_dtype).itemsize
    out_item = jnp.dtype(out_dtype).itemsize
    weight_bytes = ((d_in * d_hidden + d_hidden * d_out
                     + (d_in * d_out if residual else 0)) * w_item
                    + (3 * d_hidden + d_out) * 4)
    # per-row: double-buffered x / out tiles + f32 intermediates (h, hn, a, out)
    per_row = (2 * d_in * w_item + 2 * d_out * out_item
               + 3 * d_hidden * 4 + d_out * 4)
    budget = 40 * _MIB
    tm_cap = max(8, min(512, ((budget - weight_bytes) // per_row) // 8 * 8))

    tm = min(m, tm_cap)
    if m > 256:
        # guarantee >= 2 grid steps so megacore ("parallel") can shard rows.
        tm = min(tm, _round_up(pl.cdiv(m, 2), 8))
    grid = (pl.cdiv(m, tm),)

    est_vmem = weight_bytes + tm * per_row + 2 * _MIB
    vmem_limit = int(min(56 * _MIB, max(32 * _MIB, int(est_vmem * 1.5))))

    rows = lambda i: (i, 0)
    whole = lambda i: (0, 0)

    flops = 2 * m * d_in * d_hidden + 2 * m * d_hidden * d_out
    if residual:
        flops += 2 * m * d_in * d_out

    def run(single_buffer):
        def resident(shape):
            # constant index_map -> fetched once; single-buffer it to halve
            # its VMEM footprint (review item).
            if single_buffer:
                return pl.BlockSpec(shape, whole, pipeline_mode=pl.Buffered(1))
            return pl.BlockSpec(shape, whole)

        in_arrs = [x2, w1c, b1f, gf, bef, w2ac]
        in_specs = [pl.BlockSpec((tm, d_in), rows),
                    resident(w1c.shape), resident(b1f.shape),
                    resident(gf.shape), resident(bef.shape),
                    resident(w2ac.shape)]
        if residual:
            in_arrs.append(w2bc)
            in_specs.append(resident(w2bc.shape))
            kernel = functools.partial(_kernel_residual, eps=eps)
        else:
            kernel = functools.partial(_kernel_plain, eps=eps)
        in_arrs.append(b2f)
        in_specs.append(resident(b2f.shape))

        param_bytes = sum(int(a.size) * a.dtype.itemsize for a in in_arrs[1:])
        bytes_accessed = (int(x2.size) * w_item + m * d_out * out_item
                          + param_bytes)

        return pl.pallas_call(
            kernel,
            out_shape=jax.ShapeDtypeStruct((m, d_out), out_dtype),
            grid=grid,
            in_specs=in_specs,
            out_specs=pl.BlockSpec((tm, d_out), rows),
            compiler_params=pltpu.CompilerParams(
                dimension_semantics=("parallel",),
                vmem_limit_bytes=vmem_limit),
            cost_estimate=pl.CostEstimate(
                flops=int(flops), transcendentals=int(m),
                bytes_accessed=int(bytes_accessed)),
        )(*in_arrs)

    try:
        out = run(single_buffer=True)
    except Exception:
        # Fallback if this jax build rejects pipeline_mode=pl.Buffered(1).
        out = run(single_buffer=False)

    return out.reshape(*lead, d_out)


# --------------------------------------------------------------------------
# Params / reference
# --------------------------------------------------------------------------
def init_params(key, d_in, d_hidden, d_out, residual):
    ks = jax.random.split(key, 5)
    s = 0.1
    w1 = jax.random.normal(ks[0], (d_in, d_hidden), jnp.float32) * s
    b1 = jax.random.normal(ks[1], (1, d_hidden), jnp.float32) * s
    gamma = jnp.ones((1, d_hidden), jnp.float32)
    beta = jnp.zeros((1, d_hidden), jnp.float32)
    # PyTorch layer2 has weight (d_out, d_hidden [+ d_in]); we keep the
    # transposed row-blocks so the kernel never needs a concat.
    w2a = jax.random.normal(ks[2], (d_hidden, d_out), jnp.float32) * s
    w2b = (jax.random.normal(ks[3], (d_in, d_out), jnp.float32) * s
           if residual else None)
    b2 = jax.random.normal(ks[4], (1, d_out), jnp.float32) * s
    return (w1, b1, gamma, beta, w2a, w2b, b2)


def mlpend_ref(x, params, *, residual, eps=1e-5, compute_dtype=None):
    """Pure-JAX reference (PyTorch eval-mode forward). If compute_dtype is
    given, matmul operands are cast to it (to match the kernel's MXU dtype)
    while accumulation / LN stay in f32."""
    w1, b1, gamma, beta, w2a, w2b, b2 = params
    cast = (lambda a: a.astype(compute_dtype)) if compute_dtype else (lambda a: a)
    xc = cast(x)
    h = jnp.dot(xc, cast(w1), preferred_element_type=jnp.float32) + b1[0]
    mu = h.mean(-1, keepdims=True)
    var = ((h - mu) ** 2).mean(-1, keepdims=True)
    hn = (h - mu) / jnp.sqrt(var + eps) * gamma[0] + beta[0]
    a = jnp.maximum(hn, 0.0)
    out = jnp.dot(cast(a), cast(w2a), preferred_element_type=jnp.float32) + b2[0]
    if residual:
        out = out + jnp.dot(xc, cast(w2b), preferred_element_type=jnp.float32)
    return out.astype(x.dtype)


# --------------------------------------------------------------------------
# Demo
# --------------------------------------------------------------------------
if __name__ == "__main__":
    key = jax.random.PRNGKey(0)
    kx, kp1, kp2 = jax.random.split(key, 3)

    batch, seq, d_in, d_hidden, d_out = 2, 8, 32, 64, 32
    x = jax.random.normal(kx, (batch, seq, d_in), jnp.float32)

    # residual=True path (exercises the concat -> split-matmul rewrite)
    params_res = init_params(kp1, d_in, d_hidden, d_out, residual=True)
    y_res = mlpend_forward(x, params_res, residual=True)

    # residual=False path
    params_plain = init_params(kp2, d_in, d_hidden, d_out, residual=False)
    y_plain = mlpend_forward(x, params_plain, residual=False)

    jax.block_until_ready((y_res, y_plain))
    assert y_res.shape == (batch, seq, d_out)
    assert y_plain.shape == (batch, seq, d_out)

    # Tight check vs a reference using the same bf16 matmul operands...
    ref_res_bf = mlpend_ref(x, params_res, residual=True,
                            compute_dtype=jnp.bfloat16)
    ref_plain_bf = mlpend_ref(x, params_plain, residual=False,
                              compute_dtype=jnp.bfloat16)
    assert float(jnp.max(jnp.abs(y_res - ref_res_bf))) < 5e-3
    assert float(jnp.max(jnp.abs(y_plain - ref_plain_bf))) < 5e-3

    # ...and a loose sanity check vs the pure-f32 PyTorch-equivalent reference.
    ref_res = mlpend_ref(x, params_res, residual=True)
    ref_plain = mlpend_ref(x, params_plain, residual=False)
    assert float(jnp.max(jnp.abs(y_res - ref_res))) < 1e-1
    assert float(jnp.max(jnp.abs(y_plain - ref_plain))) < 1e-1

    print("KERNEL_OK")
</pallas_src>

<mosaic_0001>
module attributes {stable_mosaic.version = 11 : i64} {
  func.func @_kernel_residual(%arg0: i32, %arg1: memref<16x32xbf16, #tpu.memory_space<vmem>>, %arg2: memref<32x64xbf16, #tpu.memory_space<vmem>>, %arg3: memref<1x64xf32, #tpu.memory_space<vmem>>, %arg4: memref<1x64xf32, #tpu.memory_space<vmem>>, %arg5: memref<1x64xf32, #tpu.memory_space<vmem>>, %arg6: memref<64x32xbf16, #tpu.memory_space<vmem>>, %arg7: memref<32x32xbf16, #tpu.memory_space<vmem>>, %arg8: memref<1x32xf32, #tpu.memory_space<vmem>>, %arg9: memref<16x32xf32, #tpu.memory_space<vmem>>) attributes {dimension_semantics = [#tpu.dimension_semantics<parallel>], iteration_bounds = array<i64: 1>, scalar_prefetch = 0 : i64, scratch_operands = 0 : i64, tpu.core_type = #tpu.core_type<tc>, window_params = [{transform_indices = @transform_0, window_bounds = array<i64: 16, 32>}, {pipeline_mode = #tpu.pipeline_mode<synchronous>, transform_indices = @transform_1, window_bounds = array<i64: 32, 64>}, {pipeline_mode = #tpu.pipeline_mode<synchronous>, transform_indices = @transform_2, window_bounds = array<i64: 1, 64>}, {pipeline_mode = #tpu.pipeline_mode<synchronous>, transform_indices = @transform_3, window_bounds = array<i64: 1, 64>}, {pipeline_mode = #tpu.pipeline_mode<synchronous>, transform_indices = @transform_4, window_bounds = array<i64: 1, 64>}, {pipeline_mode = #tpu.pipeline_mode<synchronous>, transform_indices = @transform_5, window_bounds = array<i64: 64, 32>}, {pipeline_mode = #tpu.pipeline_mode<synchronous>, transform_indices = @transform_6, window_bounds = array<i64: 32, 32>}, {pipeline_mode = #tpu.pipeline_mode<synchronous>, transform_indices = @transform_7, window_bounds = array<i64: 1, 32>}, {transform_indices = @transform_8, window_bounds = array<i64: 16, 32>}]} {
    %c0 = arith.constant 0 : index
    %c0_0 = arith.constant 0 : index
    %0 = vector.load %arg1[%c0, %c0_0] : memref<16x32xbf16, #tpu.memory_space<vmem>>, vector<16x32xbf16>
    %c0_1 = arith.constant 0 : index
    %c0_2 = arith.constant 0 : index
    %1 = vector.load %arg2[%c0_1, %c0_2] : memref<32x64xbf16, #tpu.memory_space<vmem>>, vector<32x64xbf16>
    %cst = arith.constant dense<0.000000e+00> : vector<16x64xf32>
    %2 = tpu.matmul %0, %1, %cst {dimension_numbers = #tpu.dot_dimension_numbers<[1], [0], [0], [1], [0, 0, 1, 1], [], []>} : vector<16x32xbf16>, vector<32x64xbf16>, vector<16x64xf32> -> vector<16x64xf32>
    %c0_3 = arith.constant 0 : index
    %c0_4 = arith.constant 0 : index
    %3 = vector.load %arg3[%c0_3, %c0_4] : memref<1x64xf32, #tpu.memory_space<vmem>>, vector<1x64xf32>
    %4 = vector.broadcast %3 : vector<1x64xf32> to vector<16x64xf32>
    %5 = arith.addf %2, %4 : vector<16x64xf32>
    %cst_5 = arith.constant dense<0.000000e+00> : vector<16xf32>
    %6 = vector.multi_reduction <add>, %5, %cst_5 [1] : vector<16x64xf32> to vector<16xf32>
    %7 = vector.shape_cast %6 : vector<16xf32> to vector<16x1xf32>
    %cst_6 = arith.constant 6.400000e+01 : f32
    %8 = vector.broadcast %cst_6 : f32 to vector<16x1xf32>
    %9 = arith.divf %7, %8 : vector<16x1xf32>
    %10 = arith.mulf %5, %5 : vector<16x64xf32>
    %cst_7 = arith.constant dense<0.000000e+00> : vector<16xf32>
    %11 = vector.multi_reduction <add>, %10, %cst_7 [1] : vector<16x64xf32> to vector<16xf32>
    %12 = vector.shape_cast %11 : vector<16xf32> to vector<16x1xf32>
    %cst_8 = arith.constant 6.400000e+01 : f32
    %13 = vector.broadcast %cst_8 : f32 to vector<16x1xf32>
    %14 = arith.divf %12, %13 : vector<16x1xf32>
    %15 = arith.mulf %9, %9 : vector<16x1xf32>
    %16 = arith.subf %14, %15 : vector<16x1xf32>
    %cst_9 = arith.constant 0.000000e+00 : f32
    %17 = vector.broadcast %cst_9 : f32 to vector<16x1xf32>
    %18 = arith.maximumf %16, %17 : vector<16x1xf32>
    %19 = vector.broadcast %9 : vector<16x1xf32> to vector<16x64xf32>
    %20 = arith.subf %5, %19 : vector<16x64xf32>
    %cst_10 = arith.constant 9.99999974E-6 : f32
    %21 = vector.broadcast %cst_10 : f32 to vector<16x1xf32>
    %22 = arith.addf %18, %21 : vector<16x1xf32>
    %23 = math.rsqrt %22 : vector<16x1xf32>
    %24 = vector.broadcast %23 : vector<16x1xf32> to vector<16x64xf32>
    %25 = arith.mulf %20, %24 : vector<16x64xf32>
    %c0_11 = arith.constant 0 : index
    %c0_12 = arith.constant 0 : index
    %26 = vector.load %arg4[%c0_11, %c0_12] : memref<1x64xf32, #tpu.memory_space<vmem>>, vector<1x64xf32>
    %27 = vector.broadcast %26 : vector<1x64xf32> to vector<16x64xf32>
    %28 = arith.mulf %25, %27 : vector<16x64xf32>
    %c0_13 = arith.constant 0 : index
    %c0_14 = arith.constant 0 : index
    %29 = vector.load %arg5[%c0_13, %c0_14] : memref<1x64xf32, #tpu.memory_space<vmem>>, vector<1x64xf32>
    %30 = vector.broadcast %29 : vector<1x64xf32> to vector<16x64xf32>
    %31 = arith.addf %28, %30 : vector<16x64xf32>
    %cst_15 = arith.constant 0.000000e+00 : f32
    %32 = vector.broadcast %cst_15 : f32 to vector<16x64xf32>
    %33 = arith.maximumf %31, %32 : vector<16x64xf32>
    %34 = arith.truncf %33 : vector<16x64xf32> to vector<16x64xbf16>
    %c0_16 = arith.constant 0 : index
    %c0_17 = arith.constant 0 : index
    %35 = vector.load %arg6[%c0_16, %c0_17] : memref<64x32xbf16, #tpu.memory_space<vmem>>, vector<64x32xbf16>
    %cst_18 = arith.constant dense<0.000000e+00> : vector<16x32xf32>
    %36 = tpu.matmul %34, %35, %cst_18 {dimension_numbers = #tpu.dot_dimension_numbers<[1], [0], [0], [1], [0, 0, 1, 1], [], []>} : vector<16x64xbf16>, vector<64x32xbf16>, vector<16x32xf32> -> vector<16x32xf32>
    %c0_19 = arith.constant 0 : index
    %c0_20 = arith.constant 0 : index
    %37 = vector.load %arg8[%c0_19, %c0_20] : memref<1x32xf32, #tpu.memory_space<vmem>>, vector<1x32xf32>
    %38 = vector.broadcast %37 : vector<1x32xf32> to vector<16x32xf32>
    %39 = arith.addf %36, %38 : vector<16x32xf32>
    %c0_21 = arith.constant 0 : index
    %c0_22 = arith.constant 0 : index
    %40 = vector.load %arg7[%c0_21, %c0_22] : memref<32x32xbf16, #tpu.memory_space<vmem>>, vector<32x32xbf16>
    %cst_23 = arith.constant dense<0.000000e+00> : vector<16x32xf32>
    %41 = tpu.matmul %0, %40, %cst_23 {dimension_numbers = #tpu.dot_dimension_numbers<[1], [0], [0], [1], [0, 0, 1, 1], [], []>} : vector<16x32xbf16>, vector<32x32xbf16>, vector<16x32xf32> -> vector<16x32xf32>
    %42 = arith.addf %39, %41 : vector<16x32xf32>
    %c0_24 = arith.constant 0 : index
    %c0_25 = arith.constant 0 : index
    %43 = vector.load %arg9[%c0_24, %c0_25] : memref<16x32xf32, #tpu.memory_space<vmem>>, vector<16x32xf32>
    tpu.vector_store %arg9[%c0_24, %c0_25], %42 {strides = array<i32>} : memref<16x32xf32, #tpu.memory_space<vmem>>, vector<16x32xf32>,
    return
  }
  func.func @transform_0(%arg0: i32) -> (i32, i32) {
    %c0_i32 = arith.constant 0 : i32
    %c0_i32_0 = arith.constant 0 : i32
    return %arg0, %c0_i32 : i32, i32
  }
  func.func @transform_1(%arg0: i32) -> (i32, i32) {
    %c0_i32 = arith.constant 0 : i32
    %c0_i32_0 = arith.constant 0 : i32
    %c0_i32_1 = arith.constant 0 : i32
    return %c0_i32, %c0_i32_0 : i32, i32
  }
  func.func @transform_2(%arg0: i32) -> (i32, i32) {
    %c0_i32 = arith.constant 0 : i32
    %c0_i32_0 = arith.constant 0 : i32
    %c0_i32_1 = arith.constant 0 : i32
    return %c0_i32, %c0_i32_0 : i32, i32
  }
  func.func @transform_3(%arg0: i32) -> (i32, i32) {
    %c0_i32 = arith.constant 0 : i32
    %c0_i32_0 = arith.constant 0 : i32
    %c0_i32_1 = arith.constant 0 : i32
    return %c0_i32, %c0_i32_0 : i32, i32
  }
  func.func @transform_4(%arg0: i32) -> (i32, i32) {
    %c0_i32 = arith.constant 0 : i32
    %c0_i32_0 = arith.constant 0 : i32
    %c0_i32_1 = arith.constant 0 : i32
    return %c0_i32, %c0_i32_0 : i32, i32
  }
  func.func @transform_5(%arg0: i32) -> (i32, i32) {
    %c0_i32 = arith.constant 0 : i32
    %c0_i32_0 = arith.constant 0 : i32
    %c0_i32_1 = arith.constant 0 : i32
    return %c0_i32, %c0_i32_0 : i32, i32
  }
  func.func @transform_6(%arg0: i32) -> (i32, i32) {
    %c0_i32 = arith.constant 0 : i32
    %c0_i32_0 = arith.constant 0 : i32
    %c0_i32_1 = arith.constant 0 : i32
    return %c0_i32, %c0_i32_0 : i32, i32
  }
  func.func @transform_7(%arg0: i32) -> (i32, i32) {
    %c0_i32 = arith.constant 0 : i32
    %c0_i32_0 = arith.constant 0 : i32
    %c0_i32_1 = arith.constant 0 : i32
    return %c0_i32, %c0_i32_0 : i32, i32
  }
  func.func @transform_8(%arg0: i32) -> (i32, i32) {
    %c0_i32 = arith.constant 0 : i32
    %c0_i32_0 = arith.constant 0 : i32
    return %arg0, %c0_i32 : i32, i32
  }
}

module attributes {stable_mosaic.version = 11 : i64} {
  func.func @_kernel_residual(%arg0: i32, %arg1: memref<16x32xbf16, #tpu.memory_space<vmem>>, %arg2: memref<32x64xbf16, #tpu.memory_space<vmem>>, %arg3: memref<1x64xf32, #tpu.memory_space<vmem>>, %arg4: memref<1x64xf32, #tpu.memory_space<vmem>>, %arg5: memref<1x64xf32, #tpu.memory_space<vmem>>, %arg6: memref<64x32xbf16, #tpu.memory_space<vmem>>, %arg7: memref<32x32xbf16, #tpu.memory_space<vmem>>, %arg8: memref<1x32xf32, #tpu.memory_space<vmem>>, %arg9: memref<16x32xf32, #tpu.memory_space<vmem>>) attributes {dimension_semantics = [#tpu.dimension_semantics<parallel>], iteration_bounds = array<i64: 1>, scalar_prefetch = 0 : i64, scratch_operands = 0 : i64, tpu.core_type = #tpu.core_type<tc>, window_params = [{transform_indices = @transform_0, window_bounds = array<i64: 16, 32>}, {pipeline_mode = #tpu.pipeline_mode<synchronous>, transform_indices = @transform_1, window_bounds = array<i64: 32, 64>}, {pipeline_mode = #tpu.pipeline_mode<synchronous>, transform_indices = @transform_2, window_bounds = array<i64: 1, 64>}, {pipeline_mode = #tpu.pipeline_mode<synchronous>, transform_indices = @transform_3, window_bounds = array<i64: 1, 64>}, {pipeline_mode = #tpu.pipeline_mode<synchronous>, transform_indices = @transform_4, window_bounds = array<i64: 1, 64>}, {pipeline_mode = #tpu.pipeline_mode<synchronous>, transform_indices = @transform_5, window_bounds = array<i64: 64, 32>}, {pipeline_mode = #tpu.pipeline_mode<synchronous>, transform_indices = @transform_6, window_bounds = array<i64: 32, 32>}, {pipeline_mode = #tpu.pipeline_mode<synchronous>, transform_indices = @transform_7, window_bounds = array<i64: 1, 32>}, {transform_indices = @transform_8, window_bounds = array<i64: 16, 32>}]} {
    %c0 = arith.constant 0 : index
    %c0_0 = arith.constant 0 : index
    %0 = vector.load %arg1[%c0, %c0_0] : memref<16x32xbf16, #tpu.memory_space<vmem>>, vector<16x32xbf16>
    %c0_1 = arith.constant 0 : index
    %c0_2 = arith.constant 0 : index
    %1 = vector.load %arg2[%c0_1, %c0_2] : memref<32x64xbf16, #tpu.memory_space<vmem>>, vector<32x64xbf16>
    %cst = arith.constant dense<0.000000e+00> : vector<16x64xf32>
    %2 = tpu.matmul %0, %1, %cst {dimension_numbers = #tpu.dot_dimension_numbers<[1], [0], [0], [1], [0, 0, 1, 1], [], []>} : vector<16x32xbf16>, vector<32x64xbf16>, vector<16x64xf32> -> vector<16x64xf32>
    %c0_3 = arith.constant 0 : index
    %c0_4 = arith.constant 0 : index
    %3 = vector.load %arg3[%c0_3, %c0_4] : memref<1x64xf32, #tpu.memory_space<vmem>>, vector<1x64xf32>
    %4 = vector.broadcast %3 : vector<1x64xf32> to vector<16x64xf32>
    %5 = arith.addf %2, %4 : vector<16x64xf32>
    %cst_5 = arith.constant dense<0.000000e+00> : vector<16xf32>
    %6 = vector.multi_reduction <add>, %5, %cst_5 [1] : vector<16x64xf32> to vector<16xf32>
    %7 = vector.shape_cast %6 : vector<16xf32> to vector<16x1xf32>
    %cst_6 = arith.constant 6.400000e+01 : f32
    %8 = vector.broadcast %cst_6 : f32 to vector<16x1xf32>
    %9 = arith.divf %7, %8 : vector<16x1xf32>
    %10 = arith.mulf %5, %5 : vector<16x64xf32>
    %cst_7 = arith.constant dense<0.000000e+00> : vector<16xf32>
    %11 = vector.multi_reduction <add>, %10, %cst_7 [1] : vector<16x64xf32> to vector<16xf32>
    %12 = vector.shape_cast %11 : vector<16xf32> to vector<16x1xf32>
    %cst_8 = arith.constant 6.400000e+01 : f32
    %13 = vector.broadcast %cst_8 : f32 to vector<16x1xf32>
    %14 = arith.divf %12, %13 : vector<16x1xf32>
    %15 = arith.mulf %9, %9 : vector<16x1xf32>
    %16 = arith.subf %14, %15 : vector<16x1xf32>
    %cst_9 = arith.constant 0.000000e+00 : f32
    %17 = vector.broadcast %cst_9 : f32 to vector<16x1xf32>
    %18 = arith.maximumf %16, %17 : vector<16x1xf32>
    %19 = vector.broadcast %9 : vector<16x1xf32> to vector<16x64xf32>
    %20 = arith.subf %5, %19 : vector<16x64xf32>
    %cst_10 = arith.constant 9.99999974E-6 : f32
    %21 = vector.broadcast %cst_10 : f32 to vector<16x1xf32>
    %22 = arith.addf %18, %21 : vector<16x1xf32>
    %23 = math.rsqrt %22 : vector<16x1xf32>
    %24 = vector.broadcast %23 : vector<16x1xf32> to vector<16x64xf32>
    %25 = arith.mulf %20, %24 : vector<16x64xf32>
    %c0_11 = arith.constant 0 : index
    %c0_12 = arith.constant 0 : index
    %26 = vector.load %arg4[%c0_11, %c0_12] : memref<1x64xf32, #tpu.memory_space<vmem>>, vector<1x64xf32>
    %27 = vector.broadcast %26 : vector<1x64xf32> to vector<16x64xf32>
    %28 = arith.mulf %25, %27 : vector<16x64xf32>
    %c0_13 = arith.constant 0 : index
    %c0_14 = arith.constant 0 : index
    %29 = vector.load %arg5[%c0_13, %c0_14] : memref<1x64xf32, #tpu.memory_space<vmem>>, vector<1x64xf32>
    %30 = vector.broadcast %29 : vector<1x64xf32> to vector<16x64xf32>
    %31 = arith.addf %28, %30 : vector<16x64xf32>
    %cst_15 = arith.constant 0.000000e+00 : f32
    %32 = vector.broadcast %cst_15 : f32 to vector<16x64xf32>
    %33 = arith.maximumf %31, %32 : vector<16x64xf32>
    %34 = arith.truncf %33 : vector<16x64xf32> to vector<16x64xbf16>
    %c0_16 = arith.constant 0 : index
    %c0_17 = arith.constant 0 : index
    %35 = vector.load %arg6[%c0_16, %c0_17] : memref<64x32xbf16, #tpu.memory_space<vmem>>, vector<64x32xbf16>
    %cst_18 = arith.constant dense<0.000000e+00> : vector<16x32xf32>
    %36 = tpu.matmul %34, %35, %cst_18 {dimension_numbers = #tpu.dot_dimension_numbers<[1], [0], [0], [1], [0, 0, 1, 1], [], []>} : vector<16x64xbf16>, vector<64x32xbf16>, vector<16x32xf32> -> vector<16x32xf32>
    %c0_19 = arith.constant 0 : index
    %c0_20 = arith.constant 0 : index
    %37 = vector.load %arg8[%c0_19, %c0_20] : memref<1x32xf32, #tpu.memory_space<vmem>>, vector<1x32xf32>
    %38 = vector.broadcast %37 : vector<1x32xf32> to vector<16x32xf32>
    %39 = arith.addf %36, %38 : vector<16x32xf32>
    %c0_21 = arith.constant 0 : index
    %c0_22 = arith.constant 0 : index
    %40 = vector.load %arg7[%c0_21, %c0_22] : memref<32x32xbf16, #tpu.memory_space<vmem>>, vector<32x32xbf16>
    %cst_23 = arith.constant dense<0.000000e+00> : vector<16x32xf32>
    %41 = tpu.matmul %0, %40, %cst_23 {dimension_numbers = #tpu.dot_dimension_numbers<[1], [0], [0], [1], [0, 0, 1, 1], [], []>} : vector<16x32xbf16>, vector<32x32xbf16>, vector<16x32xf32> -> vector<16x32xf32>
    %42 = arith.addf %39, %41 : vector<16x32xf32>
    %c0_24 = arith.constant 0 : index
    %c0_25 = arith.constant 0 : index
    %43 = vector.load %arg9[%c0_24, %c0_25] : memref<16x32xf32, #tpu.memory_space<vmem>>, vector<16x32xf32>
    tpu.vector_store %arg9[%c0_24, %c0_25], %42 {strides = array<i32>} : memref<16x32xf32, #tpu.memory_space<vmem>>, vector<16x32xf32>,
    return
  }
  func.func @transform_0(%arg0: i32) -> (i32, i32) {
    %c0_i32 = arith.constant 0 : i32
    %c0_i32_0 = arith.constant 0 : i32
    return %arg0, %c0_i32 : i32, i32
  }
  func.func @transform_1(%arg0: i32) -> (i32, i32) {
    %c0_i32 = arith.constant 0 : i32
    %c0_i32_0 = arith.constant 0 : i32
    %c0_i32_1 = arith.constant 0 : i32
    return %c0_i32, %c0_i32_0 : i32, i32
  }
  func.func @transform_2(%arg0: i32) -> (i32, i32) {
    %c0_i32 = arith.constant 0 : i32
    %c0_i32_0 = arith.constant 0 : i32
    %c0_i32_1 = arith.constant 0 : i32
    return %c0_i32, %c0_i32_0 : i32, i32
  }
  func.func @transform_3(%arg0: i32) -> (i32, i32) {
    %c0_i32 = arith.constant 0 : i32
    %c0_i32_0 = arith.constant 0 : i32
    %c0_i32_1 = arith.constant 0 : i32
    return %c0_i32, %c0_i32_0 : i32, i32
  }
  func.func @transform_4(%arg0: i32) -> (i32, i32) {
    %c0_i32 = arith.constant 0 : i32
    %c0_i32_0 = arith.constant 0 : i32
    %c0_i32_1 = arith.constant 0 : i32
    return %c0_i32, %c0_i32_0 : i32, i32
  }
  func.func @transform_5(%arg0: i32) -> (i32, i32) {
    %c0_i32 = arith.constant 0 : i32
    %c0_i32_0 = arith.constant 0 : i32
    %c0_i32_1 = arith.constant 0 : i32
    return %c0_i32, %c0_i32_0 : i32, i32
  }
  func.func @transform_6(%arg0: i32) -> (i32, i32) {
    %c0_i32 = arith.constant 0 : i32
    %c0_i32_0 = arith.constant 0 : i32
    %c0_i32_1 = arith.constant 0 : i32
    return %c0_i32, %c0_i32_0 : i32, i32
  }
  func.func @transform_7(%arg0: i32) -> (i32, i32) {
    %c0_i32 = arith.constant 0 : i32
    %c0_i32_0 = arith.constant 0 : i32
    %c0_i32_1 = arith.constant 0 : i32
    return %c0_i32, %c0_i32_0 : i32, i32
  }
  func.func @transform_8(%arg0: i32) -> (i32, i32) {
    %c0_i32 = arith.constant 0 : i32
    %c0_i32_0 = arith.constant 0 : i32
    return %arg0, %c0_i32 : i32, i32
  }
}

</mosaic_0001>

<bundles_post_ra>
// kernel: tpu_custom_call.1
= control target key start
LH: loop header
LB: loop body
LE: loop exit
PB: predicated region body
PF: predicated region fallthrough
CT: control target
= control target key end

     0   :  { %v422_v1 = vmov 0.0   ;;  %vm423_vm0 = vmmov 0   ;;  %vm61_vm1 = vcmask 261120   ;;  %s532_s0 = inlined_call_operand.vmem [shape: bf16[16,32], index: 0, kind: input, shape index: {}]   ;;  %s533_s1 = inlined_call_operand.vmem [shape: bf16[32,64], index: 1, kind: input, shape index: {}]   ;;  %s534_s2 = inlined_call_operand.vmem [shape: f32[1,64], index: 2, kind: input, shape index: {}]   ;;  %s535_s3 = inlined_call_operand.vmem [shape: f32[1,64], index: 3, kind: input, shape index: {}]   ;;  %s536_s4 = inlined_call_operand.vmem [shape: f32[1,64], index: 4, kind: input, shape index: {}]   ;;  %s537_s5 = inlined_call_operand.vmem [shape: bf16[64,32], index: 5, kind: input, shape index: {}]   ;;  %s538_s6 = inlined_call_operand.vmem [shape: bf16[32,32], index: 6, kind: input, shape index: {}]   ;;  %s539_s7 = inlined_call_operand.vmem [shape: f32[1,32], index: 7, kind: input, shape index: {}]   ;;  %s540_s8 = inlined_call_operand.hbm [shape: f32[16,32], index: 8, kind: output, shape index: {}]  }
   0x1   :  { %v385_v0 = vld [vmem:[%s533_s1] sm:$0xff]   ;;  %348 = vmatprep.subr.bf16.mxu0 %v422_v1  ;;  %356 = vmatprep.subr.bf16.mxu1 %v422_v1  ;;  %v386_v2 = vld [vmem:[%s533_s1 + $0x8] sm:$0xff]  }
   0x2   :  { %349 = vmatpush3.bf16.msra.mxu0 %v385_v0  ;;  %352 = vmatprep.mubr.msk.bf16.mxu0 %vm423_vm0, %v422_v1  ;;  %v387_v3 = vld [vmem:[%s532_s0] sm:$0xff]  }
   0x3   :  { %350 = vmatprep.subr.bf16.mxu0 %v422_v1  ;;  %364 = vmatprep.mubr.msk.bf16.mxu1 %vm423_vm0, %v422_v1 }
   0x6   :  { %351 = vmatpush3.bf16.msra.mxu0 %v386_v2 }
   0x7   :  { %368 = vmatprep.subr.bf16.mxu0 %v422_v1 }
   0x8   :  { %13 = vsyncpa [#allocation3], 0  ;;  %v321_v4 = vld [vmem:[%s534_s2] ss:$0 sm:$0xff]  ;;  %vm106_vm2 = vcmask 523264   ;;  %v389_v19 = vld [vmem:[%s537_s5 + $0x8] sm:$0xff]  }
   0x9   :  { %353 = vmatmul.mubr.msk.bf16.vlgmr.msra.gmra.mrb[0].mxu0 %vm61_vm1, %v387_v3  ;;  %v388_v17 = vld [vmem:[%s537_s5] sm:$0xff]   ;;  %v392_v20 = vld [vmem:[%s538_s6 + $0x8] sm:$0xff]   ;;  %v391_v21 = vld [vmem:[%s537_s5 + $0x10] sm:$0xff]  }
   0xa   :  { %372 = vmatprep.mubr.msk.bf16.mxu0 %vm423_vm0, %v422_v1  ;;  %v390_v18 = vld [vmem:[%s538_s6] sm:$0xff]   ;;  %357 = vmatpush3.bf16.msra.mxu1 %v388_v17  ;;  %v393_v22 = vld [vmem:[%s537_s5 + $0x18] sm:$0xff]  }
   0xb   :  { %369 = vmatpush3.bf16.msra.mxu0 %v390_v18  ;;  %358 = vmatprep.subr.bf16.mxu1 %v422_v1  ;;  %v326_v41 = vld [vmem:[%s535_s3] ss:$0 sm:$0xff] }
   0xc   :  { %370 = vmatprep.subr.bf16.mxu0 %v422_v1  ;;  %v327_v46 = vld [vmem:[%s536_s4] ss:$0 sm:$0xff]  ;;  %s424_s4 = smov [#allocation2]  }
   0xd   :  { %v328_v58 = vld [vmem:[%s539_s7] ss:$0 sm:$0xff]  ;;  %s310_s25 = sshll.u32 %s424_s4, 4  ;;  %s311_s25 = int_to_ptr.vmem [resolvable:$true] %s310_s25 }
   0xe   :  { %359 = vmatpush3.bf16.msra.mxu1 %v389_v19  ;;  %s398_s26 = scalar_lea.vmem %s311_s25, 256  ;;  %p403_p1 = scmp.lt.s32.totalorder %s311_s25, %s311_s25 }
   0xf   :  { %371 = vmatpush3.bf16.msra.mxu0 %v392_v20  ;;  %360 = vmatprep.subr.bf16.mxu1 %v422_v1  ;;  %p399_p0 = scmp.ne.s32.totalorder %s311_s25, %s398_s26  ;;  %p404_p2 = scmp.lt.s32.totalorder %s398_s26, %s398_s26 }
  0x11   :  { %p405_p3 = por %p404_p2, %p403_p1 }
  0x12   :  { %373 = vmatmul.mubr.msk.bf16.vlgmr.msra.gmra.mrb[4].mxu0 %vm61_vm1, %v387_v3  ;;  %361 = vmatpush3.bf16.msra.mxu1 %v391_v21 }
  0x13   :  { %362 = vmatprep.subr.bf16.mxu1 %v422_v1  ;;  %p406_p4 = pnand %p405_p3, %p399_p0 }
  0x16   :  { %363 = vmatpush3.bf16.msra.mxu1 %v393_v22 }
  0xdc   :  { %v99_v5 = vpop.f32.mrb[0].mxu0 }
  0xdd   :  { %v100_v6 = vadd.f32 %v321_v4, %v99_v5  ;;  %v354_v7 = vpop.f32.mrb[1].mxu0 }
  0xde   :  { %v102_v8 = vpop.f32.mrb[2].mxu0 }
  0xdf   :  { %v103_v9 = vadd.f32 %v321_v4, %v102_v8  ;;  %v355_v10 = vpop.f32.mrb[3].mxu0  ;;  %v107_v11 = vsel %vm106_vm2, %v100_v6, 0.0  ;;  %v116_v12 = vmul.f32 %v100_v6, %v100_v6 }
  0xe0   :  { %108 = vadd.xlane.f32.xlu0 %v107_v11 }
  0xe1   :  { %v118_v13 = vsel %vm106_vm2, %v116_v12, 0.0  ;;  %v117_v14 = vmul.f32 %v103_v9, %v103_v9  ;;  %v110_v15 = vsel %vm106_vm2, %v103_v9, 0.0 }
  0xe2   :  { %119 = vadd.xlane.f32.xlu1 %v118_v13 }
  0xe3   :  { %v121_v16 = vsel %vm106_vm2, %v117_v14, 0.0 }
  0xe4   :  { %111 = vadd.xlane.f32.xlu0 %v110_v15 }
  0xe5   :  { %v294_v54 = vpop.f32.mrb[4].mxu0 }
  0xe6   :  { %122 = vadd.xlane.f32.xlu1 %v121_v16  ;;  %v374_v55 = vpop.f32.mrb[5].mxu0 }
  0xe7   :  { %v297_v56 = vpop.f32.mrb[6].mxu0 }
  0xe8   :  { %v375_v57 = vpop.f32.mrb[7].mxu0 }
 0x16d   :  { %v109_v23 = vpop.xlane.xlu0 %108 }
 0x16e   :  { %v114_v24 = vmul.f32 0.015625, %v109_v23 }
 0x16f   :  { %v120_v25 = vpop.xlane.xlu1 %119 }
 0x170   :  { %v126_v26 = vmul.f32 %v114_v24, %v114_v24  ;;  %v124_v27 = vmul.f32 0.015625, %v120_v25  ;;  %v132_v39 = vsub.f32 %v100_v6, %v114_v24 }
 0x171   :  { %v112_v28 = vpop.xlane.xlu0 %111 }
 0x172   :  { %v128_v29 = vsub.f32 %v124_v27, %v126_v26  ;;  %v115_v30 = vmul.f32 0.015625, %v112_v28 }
 0x173   :  { %v123_v31 = vpop.xlane.xlu1 %122 }
 0x174   :  { %v130_v32 = vmax.f32 %v128_v29, 0.0  ;;  %v127_v33 = vmul.f32 %v115_v30, %v115_v30  ;;  %v125_v34 = vmul.f32 0.015625, %v123_v31  ;;  %v133_v43 = vsub.f32 %v103_v9, %v115_v30 }
 0x176   :  { %v134_v35 = vadd.f32 1e-05, %v130_v32  ;;  %v129_v36 = vsub.f32 %v125_v34, %v127_v33 }
 0x178   :  { %394 = vrsqrt.f32 %v134_v35  ;;  %v131_v37 = vmax.f32 %v129_v36, 0.0 }
 0x17a   :  { %v135_v38 = vadd.f32 1e-05, %v131_v37 }
 0x17c   :  { %396 = vrsqrt.f32 %v135_v38 }
 0x182   :  { %v395_v40 = vpop.eup %394 }
 0x183   :  { %v138_v42 = vmul.f32 %v395_v40, %v132_v39 }
 0x185   :  { %v147_v44 = vmul.f32 %v326_v41, %v138_v42 }
 0x186   :  { %v397_v45 = vpop.eup %396 }
 0x187   :  { %v139_v47 = vmul.f32 %v397_v45, %v133_v43  ;;  %v156_v49 = vadd.f32 %v327_v46, %v147_v44 }
 0x189   :  { %v148_v48 = vmul.f32 %v326_v41, %v139_v47  ;;  %v158_v51 = vmax.f32 %v156_v49, 0.0 }
 0x18b   :  { %v157_v50 = vadd.f32 %v327_v46, %v148_v48 }
 0x18d   :  { %v159_v52 = vmax.f32 %v157_v50, 0.0 }
 0x18f   :  { %v160_v53 = vpack.c.bf16 %v159_v52, %v158_v51 }
 0x191   :  { %365 = vmatmul.mubr.msk.bf16.vlgmr.msra.gmra.mrb[0].mxu1 %vm106_vm2, %v160_v53 }
 0x264   :  { %v237_v59 = vpop.f32.mrb[0].mxu1 }
 0x265   :  { %v238_v60 = vadd.f32 %v328_v58, %v237_v59  ;;  %v366_v61 = vpop.f32.mrb[1].mxu1 }
 0x266   :  { %v240_v62 = vpop.f32.mrb[2].mxu1 }
 0x267   :  { %v301_v63 = vadd.f32 %v294_v54, %v238_v60  ;;  %v241_v0 = vadd.f32 %v328_v58, %v240_v62  ;;  %v367_v1 = vpop.f32.mrb[3].mxu1 }
 0x269   :  { %303 = vst.msk [vmem:[#allocation2] sm:$0xff] %vm61_vm1, %v301_v63  ;;  %v302_v2 = vadd.f32 %v297_v56, %v241_v0 }
 0x26b   :  { %304 = vst.msk [vmem:[#allocation2 + $0x8] sm:$0xff] %vm61_vm1, %v302_v2 }
 0x26c   :  { %409 = shalt.err (!%p406_p4)
}
 0x26d   :  { %s410_s28 = scalar_lea.hbm %s540_s8, 256 }
 0x26e   :  { %p411_p5 = scmp.ne.s32.totalorder %s540_s8, %s410_s28  ;;  %p414_p6 = scmp.lt.u32.totalorder %s410_s28, %s540_s8 }
 0x270   :  { %p416_p7 = pnand %p414_p6, %p411_p5 }
 0x272   :  { %419 = shalt.err (!%p416_p7)
}
 0x273   :  { %s425_s11 = smov 128   ;;  %s426_s12 = smov 8  }
 0x274   :  { %316 = dma.vmem_to_hbm [thread:$0]  %s311_s25, 256, %s540_s8, [#allocation3], %s425_s11, %s425_s11, %s426_s12  }
 0x275   :  { %420 = dma.done.wait [#allocation3], 256  }
 0x276   :  { %421 = vsyncadd [#allocation3], 4294967040 }
 0x277   :  { %320 = vsyncpa [#allocation3], 1 }

// kernel: tpu_custom_call.1
= control target key start
LH: loop header
LB: loop body
LE: loop exit
PB: predicated region body
PF: predicated region fallthrough
CT: control target
= control target key end

     0   :  { %v422_v1 = vmov 0.0   ;;  %vm423_vm0 = vmmov 0   ;;  %vm61_vm1 = vcmask 261120   ;;  %s532_s0 = inlined_call_operand.vmem [shape: bf16[16,32], index: 0, kind: input, shape index: {}]   ;;  %s533_s1 = inlined_call_operand.vmem [shape: bf16[32,64], index: 1, kind: input, shape index: {}]   ;;  %s534_s2 = inlined_call_operand.vmem [shape: f32[1,64], index: 2, kind: input, shape index: {}]   ;;  %s535_s3 = inlined_call_operand.vmem [shape: f32[1,64], index: 3, kind: input, shape index: {}]   ;;  %s536_s4 = inlined_call_operand.vmem [shape: f32[1,64], index: 4, kind: input, shape index: {}]   ;;  %s537_s5 = inlined_call_operand.vmem [shape: bf16[64,32], index: 5, kind: input, shape index: {}]   ;;  %s538_s6 = inlined_call_operand.vmem [shape: bf16[32,32], index: 6, kind: input, shape index: {}]   ;;  %s539_s7 = inlined_call_operand.vmem [shape: f32[1,32], index: 7, kind: input, shape index: {}]   ;;  %s540_s8 = inlined_call_operand.hbm [shape: f32[16,32], index: 8, kind: output, shape index: {}]  }
   0x1   :  { %v385_v0 = vld [vmem:[%s533_s1] sm:$0xff]   ;;  %348 = vmatprep.subr.bf16.mxu0 %v422_v1  ;;  %356 = vmatprep.subr.bf16.mxu1 %v422_v1  ;;  %v386_v2 = vld [vmem:[%s533_s1 + $0x8] sm:$0xff]  }
   0x2   :  { %349 = vmatpush3.bf16.msra.mxu0 %v385_v0  ;;  %352 = vmatprep.mubr.msk.bf16.mxu0 %vm423_vm0, %v422_v1  ;;  %v387_v3 = vld [vmem:[%s532_s0] sm:$0xff]  }
   0x3   :  { %350 = vmatprep.subr.bf16.mxu0 %v422_v1  ;;  %364 = vmatprep.mubr.msk.bf16.mxu1 %vm423_vm0, %v422_v1 }
   0x6   :  { %351 = vmatpush3.bf16.msra.mxu0 %v386_v2 }
   0x7   :  { %368 = vmatprep.subr.bf16.mxu0 %v422_v1 }
   0x8   :  { %13 = vsyncpa [#allocation3], 0  ;;  %v321_v4 = vld [vmem:[%s534_s2] ss:$0 sm:$0xff]  ;;  %vm106_vm2 = vcmask 523264   ;;  %v389_v19 = vld [vmem:[%s537_s5 + $0x8] sm:$0xff]  }
   0x9   :  { %353 = vmatmul.mubr.msk.bf16.vlgmr.msra.gmra.mrb[0].mxu0 %vm61_vm1, %v387_v3  ;;  %v388_v17 = vld [vmem:[%s537_s5] sm:$0xff]   ;;  %v392_v20 = vld [vmem:[%s538_s6 + $0x8] sm:$0xff]   ;;  %v391_v21 = vld [vmem:[%s537_s5 + $0x10] sm:$0xff]  }
   0xa   :  { %372 = vmatprep.mubr.msk.bf16.mxu0 %vm423_vm0, %v422_v1  ;;  %v390_v18 = vld [vmem:[%s538_s6] sm:$0xff]   ;;  %357 = vmatpush3.bf16.msra.mxu1 %v388_v17  ;;  %v393_v22 = vld [vmem:[%s537_s5 + $0x18] sm:$0xff]  }
   0xb   :  { %369 = vmatpush3.bf16.msra.mxu0 %v390_v18  ;;  %358 = vmatprep.subr.bf16.mxu1 %v422_v1  ;;  %v326_v41 = vld [vmem:[%s535_s3] ss:$0 sm:$0xff] }
   0xc   :  { %370 = vmatprep.subr.bf16.mxu0 %v422_v1  ;;  %v327_v46 = vld [vmem:[%s536_s4] ss:$0 sm:$0xff]  ;;  %s424_s4 = smov [#allocation2]  }
   0xd   :  { %v328_v58 = vld [vmem:[%s539_s7] ss:$0 sm:$0xff]  ;;  %s310_s25 = sshll.u32 %s424_s4, 4  ;;  %s311_s25 = int_to_ptr.vmem [resolvable:$true] %s310_s25 }
   0xe   :  { %359 = vmatpush3.bf16.msra.mxu1 %v389_v19  ;;  %s398_s26 = scalar_lea.vmem %s311_s25, 256  ;;  %p403_p1 = scmp.lt.s32.totalorder %s311_s25, %s311_s25 }
   0xf   :  { %371 = vmatpush3.bf16.msra.mxu0 %v392_v20  ;;  %360 = vmatprep.subr.bf16.mxu1 %v422_v1  ;;  %p399_p0 = scmp.ne.s32.totalorder %s311_s25, %s398_s26  ;;  %p404_p2 = scmp.lt.s32.totalorder %s398_s26, %s398_s26 }
  0x11   :  { %p405_p3 = por %p404_p2, %p403_p1 }
  0x12   :  { %373 = vmatmul.mubr.msk.bf16.vlgmr.msra.gmra.mrb[4].mxu0 %vm61_vm1, %v387_v3  ;;  %361 = vmatpush3.bf16.msra.mxu1 %v391_v21 }
  0x13   :  { %362 = vmatprep.subr.bf16.mxu1 %v422_v1  ;;  %p406_p4 = pnand %p405_p3, %p399_p0 }
  0x16   :  { %363 = vmatpush3.bf16.msra.mxu1 %v393_v22 }
  0xdc   :  { %v99_v5 = vpop.f32.mrb[0].mxu0 }
  0xdd   :  { %v100_v6 = vadd.f32 %v321_v4, %v99_v5  ;;  %v354_v7 = vpop.f32.mrb[1].mxu0 }
  0xde   :  { %v102_v8 = vpop.f32.mrb[2].mxu0 }
  0xdf   :  { %v103_v9 = vadd.f32 %v321_v4, %v102_v8  ;;  %v355_v10 = vpop.f32.mrb[3].mxu0  ;;  %v107_v11 = vsel %vm106_vm2, %v100_v6, 0.0  ;;  %v116_v12 = vmul.f32 %v100_v6, %v100_v6 }
  0xe0   :  { %108 = vadd.xlane.f32.xlu0 %v107_v11 }
  0xe1   :  { %v118_v13 = vsel %vm106_vm2, %v116_v12, 0.0  ;;  %v117_v14 = vmul.f32 %v103_v9, %v103_v9  ;;  %v110_v15 = vsel %vm106_vm2, %v103_v9, 0.0 }
  0xe2   :  { %119 = vadd.xlane.f32.xlu1 %v118_v13 }
  0xe3   :  { %v121_v16 = vsel %vm106_vm2, %v117_v14, 0.0 }
  0xe4   :  { %111 = vadd.xlane.f32.xlu0 %v110_v15 }
  0xe5   :  { %v294_v54 = vpop.f32.mrb[4].mxu0 }
  0xe6   :  { %122 = vadd.xlane.f32.xlu1 %v121_v16  ;;  %v374_v55 = vpop.f32.mrb[5].mxu0 }
  0xe7   :  { %v297_v56 = vpop.f32.mrb[6].mxu0 }
  0xe8   :  { %v375_v57 = vpop.f32.mrb[7].mxu0 }
 0x16d   :  { %v109_v23 = vpop.xlane.xlu0 %108 }
 0x16e   :  { %v114_v24 = vmul.f32 0.015625, %v109_v23 }
 0x16f   :  { %v120_v25 = vpop.xlane.xlu1 %119 }
 0x170   :  { %v126_v26 = vmul.f32 %v114_v24, %v114_v24  ;;  %v124_v27 = vmul.f32 0.015625, %v120_v25  ;;  %v132_v39 = vsub.f32 %v100_v6, %v114_v24 }
 0x171   :  { %v112_v28 = vpop.xlane.xlu0 %111 }
 0x172   :  { %v128_v29 = vsub.f32 %v124_v27, %v126_v26  ;;  %v115_v30 = vmul.f32 0.015625, %v112_v28 }
 0x173   :  { %v123_v31 = vpop.xlane.xlu1 %122 }
 0x174   :  { %v130_v32 = vmax.f32 %v128_v29, 0.0  ;;  %v127_v33 = vmul.f32 %v115_v30, %v115_v30  ;;  %v125_v34 = vmul.f32 0.015625, %v123_v31  ;;  %v133_v43 = vsub.f32 %v103_v9, %v115_v30 }
 0x176   :  { %v134_v35 = vadd.f32 1e-05, %v130_v32  ;;  %v129_v36 = vsub.f32 %v125_v34, %v127_v33 }
 0x178   :  { %394 = vrsqrt.f32 %v134_v35  ;;  %v131_v37 = vmax.f32 %v129_v36, 0.0 }
 0x17a   :  { %v135_v38 = vadd.f32 1e-05, %v131_v37 }
 0x17c   :  { %396 = vrsqrt.f32 %v135_v38 }
 0x182   :  { %v395_v40 = vpop.eup %394 }
 0x183   :  { %v138_v42 = vmul.f32 %v395_v40, %v132_v39 }
 0x185   :  { %v147_v44 = vmul.f32 %v326_v41, %v138_v42 }
 0x186   :  { %v397_v45 = vpop.eup %396 }
 0x187   :  { %v139_v47 = vmul.f32 %v397_v45, %v133_v43  ;;  %v156_v49 = vadd.f32 %v327_v46, %v147_v44 }
 0x189   :  { %v148_v48 = vmul.f32 %v326_v41, %v139_v47  ;;  %v158_v51 = vmax.f32 %v156_v49, 0.0 }
 0x18b   :  { %v157_v50 = vadd.f32 %v327_v46, %v148_v48 }
 0x18d   :  { %v159_v52 = vmax.f32 %v157_v50, 0.0 }
 0x18f   :  { %v160_v53 = vpack.c.bf16 %v159_v52, %v158_v51 }
 0x191   :  { %365 = vmatmul.mubr.msk.bf16.vlgmr.msra.gmra.mrb[0].mxu1 %vm106_vm2, %v160_v53 }
 0x264   :  { %v237_v59 = vpop.f32.mrb[0].mxu1 }
 0x265   :  { %v238_v60 = vadd.f32 %v328_v58, %v237_v59  ;;  %v366_v61 = vpop.f32.mrb[1].mxu1 }
 0x266   :  { %v240_v62 = vpop.f32.mrb[2].mxu1 }
 0x267   :  { %v301_v63 = vadd.f32 %v294_v54, %v238_v60  ;;  %v241_v0 = vadd.f32 %v328_v58, %v240_v62  ;;  %v367_v1 = vpop.f32.mrb[3].mxu1 }
 0x269   :  { %303 = vst.msk [vmem:[#allocation2] sm:$0xff] %vm61_vm1, %v301_v63  ;;  %v302_v2 = vadd.f32 %v297_v56, %v241_v0 }
 0x26b   :  { %304 = vst.msk [vmem:[#allocation2 + $0x8] sm:$0xff] %vm61_vm1, %v302_v2 }
 0x26c   :  { %409 = shalt.err (!%p406_p4)
}
 0x26d   :  { %s410_s28 = scalar_lea.hbm %s540_s8, 256 }
 0x26e   :  { %p411_p5 = scmp.ne.s32.totalorder %s540_s8, %s410_s28  ;;  %p414_p6 = scmp.lt.u32.totalorder %s410_s28, %s540_s8 }
 0x270   :  { %p416_p7 = pnand %p414_p6, %p411_p5 }
 0x272   :  { %419 = shalt.err (!%p416_p7)
}
 0x273   :  { %s425_s11 = smov 128   ;;  %s426_s12 = smov 8  }
 0x274   :  { %316 = dma.vmem_to_hbm [thread:$0]  %s311_s25, 256, %s540_s8, [#allocation3], %s425_s11, %s425_s11, %s426_s12  }
 0x275   :  { %420 = dma.done.wait [#allocation3], 256  }
 0x276   :  { %421 = vsyncadd [#allocation3], 4294967040 }
 0x277   :  { %320 = vsyncpa [#allocation3], 1 }

</bundles_post_ra>
